<compile_context>
chip_gen: v7x
topology: tpu7x:2x2x1
jax: 0.10.0
libtpu: 0.0.40
codegen_flags: <defaults>
</compile_context>

<pallas_src>
import functools

import jax
import jax.numpy as jnp
import numpy as np
from jax.experimental import pallas as pl
from jax.experimental.pallas import tpu as pltpu


def _tversky_stats_kernel(logits_ref, labels_ref, stats_ref, *, hw, tn, njs,
                          needs_mask):
    """Accumulates per-class (sum(p*t), sum(p), sum(t)) over spatial tiles."""
    s = pl.program_id(0)          # core-split index
    j = pl.program_id(2)          # spatial-chunk index within the split
    gj = s * njs + j              # global spatial block index

    @pl.when(j == 0)
    def _():
        stats_ref[...] = jnp.zeros_like(stats_ref)

    x = logits_ref[...].astype(jnp.float32)              # (C, TN)
    lbl = labels_ref[...].astype(jnp.int32)              # (1, TN)

    if needs_mask:
        col = jax.lax.broadcasted_iota(jnp.int32, (1, tn), 1) + gj * tn
        valid = col < hw                                  # (1, TN)
        # Guard against garbage (possibly NaN/Inf) in ragged / clamped blocks.
        x = jnp.where(valid, x, 0.0)
        # Invalid columns can never match any class id.
        lbl = jnp.where(valid, lbl, -1)

    # Softmax over the class (sublane) axis.
    m = jnp.max(x, axis=0, keepdims=True)                 # (1, TN)
    e = jnp.exp(x - m)                                    # (C, TN)
    denom = jnp.sum(e, axis=0, keepdims=True)             # (1, TN), in [1, C]
    r = pl.reciprocal(denom, approx=True)                 # EUP vrcp (cheap)
    r = r * (2.0 - denom * r)                             # one Newton step
    if needs_mask:
        r = jnp.where(valid, r, 0.0)                      # zeroes p off-range
    p = e * r                                             # (C, TN)

    class_ids = jax.lax.broadcasted_iota(jnp.int32, x.shape, 0)
    t = class_ids == lbl                                  # one-hot mask (bool)

    inter = jnp.sum(jnp.where(t, p, 0.0), axis=1)         # (C,)  sum(p*t)
    sum_p = jnp.sum(p, axis=1)                            # (C,)  sum(p)
    sum_t = jnp.sum(t.astype(jnp.float32), axis=1)        # (C,)  label counts
    # (3, C) accumulator; lane dim < 128 -> masked store, but it is tiny and
    # only written back to HBM once per (split, batch).
    stats_ref[...] += jnp.stack([inter, sum_p, sum_t], axis=0)


def _hw_params():
    """Per-generation step-size target / VMEM budget."""
    kind = ""
    try:
        kind = jax.devices()[0].device_kind.lower()
    except Exception:
        pass
    if "v7" in kind:
        # 64 MiB VMEM per TensorCore, ~3.2 TB/s HBM: bigger steps, tighter cap.
        cfg = dict(step_bytes=6 << 20, work_cap=6 << 20, vmem_limit=48 << 20)
    elif any(g in kind for g in ("v4", "v5", "v6")):
        # 128 MiB physical VMEM: generous scoped limit, ~4 MiB per grid step.
        cfg = dict(step_bytes=4 << 20, work_cap=8 << 20, vmem_limit=96 << 20)
    else:
        # Unknown part: stay under any default scoped-VMEM limit.
        cfg = dict(step_bytes=1 << 20, work_cap=4 << 20, vmem_limit=None)
    try:
        phys = pltpu.get_tpu_info().vmem_capacity_bytes
        if cfg["vmem_limit"] is not None:
            cfg["vmem_limit"] = min(cfg["vmem_limit"], int(phys * 3 // 4))
    except Exception:
        pass
    return cfg


def _choose_tile(hw, c, logit_bytes, label_bytes, step_bytes, work_cap):
    """Lane-tile width: ~step_bytes of HBM traffic per step, VMEM-safe."""
    per_col_hbm = logit_bytes * c + label_bytes
    tn = step_bytes // per_col_hbm
    # The kernel upcasts to f32 internally; cap the f32 working set.
    tn = min(tn, work_cap // (4 * c))
    tn = max(128, (tn // 128) * 128)
    hw_pad = pl.cdiv(hw, 128) * 128
    return int(min(tn, hw_pad))


def tversky_loss_pallas(logits, target, alpha=0.3, beta=0.7, eps=1e-7,
                        tile_n=None):
    """logits: [B, C, H, W]; target: [B, 1, H, W] or [B, H, W] integer labels.

    Returns a scalar float32 loss matching the PyTorch multi-class branch
    (num_classes > 1) of tversky_loss with dims = (0, 2, 3).
    Accepts bf16/f32 logits and int8/uint8/int32 labels without extra passes.
    """
    B, C, H, W = logits.shape
    if C == 1:
        # TODO(synk): num_classes == 1 sigmoid branch not implemented.
        raise NotImplementedError("num_classes == 1 branch not implemented")

    HW = H * W
    logits_r = logits.reshape(B, C, HW)          # free reshape, no transpose
    if target.ndim == 4:
        target = target[:, 0]
    if not jnp.issubdtype(target.dtype, jnp.integer):
        target = target.astype(jnp.int32)        # keep narrow int dtypes as-is
    labels_r = target.reshape(B, 1, HW)

    cfg = _hw_params()
    if tile_n is None:
        TN = _choose_tile(HW, C, jnp.dtype(logits.dtype).itemsize,
                          jnp.dtype(labels_r.dtype).itemsize,
                          cfg["step_bytes"], cfg["work_cap"])
    else:
        TN = max(128, (int(tile_n) // 128) * 128)
        TN = min(TN, pl.cdiv(HW, 128) * 128)

    NJ = pl.cdiv(HW, TN)
    # Leading core-split axis so v7x's two TensorCores both work even at B=1.
    n_splits = 2 if NJ >= 2 else 1
    NJS = pl.cdiv(NJ, n_splits)
    needs_mask = (n_splits * NJS * TN) != HW

    kernel = functools.partial(_tversky_stats_kernel, hw=HW, tn=TN, njs=NJS,
                               needs_mask=needs_mask)

    def in_map(s, b, j):
        # Clamp so a (masked) overhang block never DMA's fully out of range.
        return (b, 0, jnp.minimum(s * NJS + j, NJ - 1))

    comp_kwargs = dict(dimension_semantics=("parallel", "parallel",
                                            "arbitrary"))
    if cfg["vmem_limit"] is not None:
        comp_kwargs["vmem_limit_bytes"] = int(cfg["vmem_limit"])

    stats = pl.pallas_call(
        kernel,
        out_shape=jax.ShapeDtypeStruct((n_splits, B, 3, C), jnp.float32),
        grid_spec=pltpu.PrefetchScalarGridSpec(
            num_scalar_prefetch=0,
            grid=(n_splits, B, NJS),
            in_specs=[
                pl.BlockSpec((None, C, TN), in_map),
                pl.BlockSpec((None, 1, TN), in_map),
            ],
            out_specs=pl.BlockSpec((None, None, 3, C),
                                   lambda s, b, j: (s, b, 0, 0)),
        ),
        compiler_params=pltpu.CompilerParams(**comp_kwargs),
    )(logits_r, labels_r)

    # Tiny epilogue in plain JAX.
    stats = jnp.sum(stats, axis=(0, 1))          # (3, C)
    inter = stats[0]
    sum_p = stats[1]
    sum_t = stats[2]
    fps = sum_p - inter                          # sum(p * (1 - t))
    fns = sum_t - inter                          # sum((1 - p) * t)
    tversky = inter / (inter + alpha * fps + beta * fns + eps)
    return 1.0 - jnp.mean(tversky)


def _tversky_loss_ref(logits, target, alpha=0.3, beta=0.7, eps=1e-7):
    """Plain-JAX reference mirroring the PyTorch code (C > 1 branch)."""
    C = logits.shape[1]
    true = target[:, 0] if target.ndim == 4 else target        # [B, H, W]
    true_1_hot = jax.nn.one_hot(true, C, dtype=jnp.float32)    # [B, H, W, C]
    true_1_hot = jnp.transpose(true_1_hot, (0, 3, 1, 2))       # [B, C, H, W]
    probas = jax.nn.softmax(logits.astype(jnp.float32), axis=1)
    dims = (0, 2, 3)
    inter = jnp.sum(probas * true_1_hot, dims)
    fps = jnp.sum(probas * (1 - true_1_hot), dims)
    fns = jnp.sum((1 - probas) * true_1_hot, dims)
    t = inter / (inter + alpha * fps + beta * fns + eps)
    return 1.0 - jnp.mean(t)


class TverskyLoss:
    """Parameter-free module; alpha/beta are fixed hyper-parameters."""

    def __init__(self, alpha=0.3, beta=0.7):
        self.alpha = alpha
        self.beta = beta

    def __call__(self, logits, target):
        return tversky_loss_pallas(logits, target, self.alpha, self.beta)


if __name__ == "__main__":
    key = jax.random.PRNGKey(0)
    keys = jax.random.split(key, 6)
    loss_fn = TverskyLoss(alpha=0.3, beta=0.7)

    # 1) Standard small case (single tile, no mask / no split).
    B, C, H, W = 2, 4, 16, 16
    logits = jax.random.normal(keys[0], (B, C, H, W), dtype=jnp.float32)
    target = jax.random.randint(keys[1], (B, 1, H, W), 0, C, dtype=jnp.int32)
    loss = jax.block_until_ready(loss_fn(logits, target))
    ref = jax.block_until_ready(_tversky_loss_ref(logits, target, 0.3, 0.7))
    np.testing.assert_allclose(np.asarray(loss), np.asarray(ref),
                               rtol=1e-4, atol=1e-4)

    # 2) Ragged case: cdiv grid + core-split + in-kernel masking path.
    B2, C2, H2, W2 = 1, 4, 18, 18              # HW = 324, tile = 256
    logits2 = jax.random.normal(keys[2], (B2, C2, H2, W2), dtype=jnp.float32)
    target2 = jax.random.randint(keys[3], (B2, 1, H2, W2), 0, C2,
                                 dtype=jnp.int32)
    loss2 = jax.block_until_ready(
        tversky_loss_pallas(logits2, target2, 0.3, 0.7, tile_n=256))
    ref2 = jax.block_until_ready(_tversky_loss_ref(logits2, target2, 0.3, 0.7))
    np.testing.assert_allclose(np.asarray(loss2), np.asarray(ref2),
                               rtol=1e-4, atol=1e-4)

    # 3) Narrow-stream case: bf16 logits + uint8 labels, multi-step accumulate.
    B3, C3, H3, W3 = 1, 4, 32, 32              # HW = 1024, tile = 256 -> 4 blk
    logits3 = jax.random.normal(keys[4], (B3, C3, H3, W3), dtype=jnp.bfloat16)
    target3 = jax.random.randint(keys[5], (B3, H3, W3), 0, C3,
                                 dtype=jnp.int32).astype(jnp.uint8)
    loss3 = jax.block_until_ready(
        tversky_loss_pallas(logits3, target3, 0.3, 0.7, tile_n=256))
    ref3 = jax.block_until_ready(_tversky_loss_ref(logits3, target3, 0.3, 0.7))
    np.testing.assert_allclose(np.asarray(loss3), np.asarray(ref3),
                               rtol=1e-4, atol=1e-4)

    print("KERNEL_OK")
</pallas_src>

<mosaic_0001>
module attributes {stable_mosaic.version = 11 : i64} {
  func.func @_tversky_stats_kernel(%arg0: i32, %arg1: i32, %arg2: i32, %arg3: memref<1x4x256xf32, #tpu.memory_space<vmem>>, %arg4: memref<1x1x256xi32, #tpu.memory_space<vmem>>, %arg5: memref<1x1x3x4xf32, #tpu.memory_space<vmem>>) attributes {dimension_semantics = [#tpu.dimension_semantics<parallel>, #tpu.dimension_semantics<parallel>, #tpu.dimension_semantics<arbitrary>], iteration_bounds = array<i64: 1, 2, 1>, scalar_prefetch = 0 : i64, scratch_operands = 0 : i64, tpu.core_type = #tpu.core_type<tc>, window_params = [{transform_indices = @transform_0, window_bounds = array<i64: 1, 4, 256>}, {transform_indices = @transform_1, window_bounds = array<i64: 1, 1, 256>}, {transform_indices = @transform_2, window_bounds = array<i64: 1, 1, 3, 4>}]} {
    %c0_i32 = arith.constant 0 : i32
    %0 = arith.cmpi eq, %arg2, %c0_i32 : i32
    %1 = arith.extui %0 : i1 to i32
    %c0_i32_0 = arith.constant 0 : i32
    %2 = arith.cmpi ne, %1, %c0_i32_0 : i32
    scf.if %2 {
      %cst_20 = arith.constant 0.000000e+00 : f32
      %41 = vector.broadcast %cst_20 : f32 to vector<3x4xf32>
      %c0_21 = arith.constant 0 : index
      %c0_22 = arith.constant 0 : index
      %c0_23 = arith.constant 0 : index
      %c0_24 = arith.constant 0 : index
      %42 = vector.load %arg5[%c0_21, %c0_22, %c0_23, %c0_24] : memref<1x1x3x4xf32, #tpu.memory_space<vmem>>, vector<1x1x3x4xf32>
      %43 = vector.shape_cast %42 : vector<1x1x3x4xf32> to vector<3x4xf32>
      %44 = vector.shape_cast %41 : vector<3x4xf32> to vector<1x1x3x4xf32>
      tpu.vector_store %arg5[%c0_21, %c0_22, %c0_23, %c0_24], %44 {strides = array<i32>} : memref<1x1x3x4xf32, #tpu.memory_space<vmem>>, vector<1x1x3x4xf32>,
    } else {
    }
    %c0 = arith.constant 0 : index
    %c0_1 = arith.constant 0 : index
    %c0_2 = arith.constant 0 : index
    %3 = vector.load %arg3[%c0, %c0_1, %c0_2] : memref<1x4x256xf32, #tpu.memory_space<vmem>>, vector<1x4x256xf32>
    %4 = vector.shape_cast %3 : vector<1x4x256xf32> to vector<4x256xf32>
    %c0_3 = arith.constant 0 : index
    %c0_4 = arith.constant 0 : index
    %c0_5 = arith.constant 0 : index
    %5 = vector.load %arg4[%c0_3, %c0_4, %c0_5] : memref<1x1x256xi32, #tpu.memory_space<vmem>>, vector<1x1x256xi32>
    %6 = vector.shape_cast %5 : vector<1x1x256xi32> to vector<1x256xi32>
    %cst = arith.constant dense<0xFF800000> : vector<256xf32>
    %7 = vector.multi_reduction <maximumf>, %4, %cst [0] : vector<4x256xf32> to vector<256xf32>
    %8 = vector.shape_cast %7 : vector<256xf32> to vector<1x256xf32>
    %9 = vector.broadcast %8 : vector<1x256xf32> to vector<4x256xf32>
    %10 = arith.subf %4, %9 : vector<4x256xf32>
    %11 = math.exp %10 : vector<4x256xf32>
    %cst_6 = arith.constant dense<0.000000e+00> : vector<256xf32>
    %12 = vector.multi_reduction <add>, %11, %cst_6 [0] : vector<4x256xf32> to vector<256xf32>
    %13 = vector.shape_cast %12 : vector<256xf32> to vector<1x256xf32>
    %14 = tpu.reciprocal %13 {approx = true} : vector<1x256xf32> -> vector<1x256xf32>
    %15 = arith.mulf %13, %14 : vector<1x256xf32>
    %cst_7 = arith.constant 2.000000e+00 : f32
    %16 = vector.broadcast %cst_7 : f32 to vector<1x256xf32>
    %17 = arith.subf %16, %15 : vector<1x256xf32>
    %18 = arith.mulf %14, %17 : vector<1x256xf32>
    %19 = vector.broadcast %18 : vector<1x256xf32> to vector<4x256xf32>
    %20 = arith.mulf %11, %19 : vector<4x256xf32>
    %21 = tpu.iota {dimensions = array<i32: 0>} : vector<4x256xi32>
    %22 = vector.broadcast %6 : vector<1x256xi32> to vector<4x256xi32>
    %23 = arith.cmpi eq, %21, %22 : vector<4x256xi32>
    %cst_8 = arith.constant 0.000000e+00 : f32
    %24 = vector.broadcast %cst_8 : f32 to vector<4x256xf32>
    %25 = arith.select %23, %20, %24 : vector<4x256xi1>, vector<4x256xf32>
    %cst_9 = arith.constant dense<0.000000e+00> : vector<4xf32>
    %26 = vector.multi_reduction <add>, %25, %cst_9 [1] : vector<4x256xf32> to vector<4xf32>
    %cst_10 = arith.constant dense<0.000000e+00> : vector<4xf32>
    %27 = vector.multi_reduction <add>, %20, %cst_10 [1] : vector<4x256xf32> to vector<4xf32>
    %28 = arith.extui %23 : vector<4x256xi1> to vector<4x256xi32>
    %29 = arith.sitofp %28 : vector<4x256xi32> to vector<4x256xf32>
    %cst_11 = arith.constant dense<0.000000e+00> : vector<4xf32>
    %30 = vector.multi_reduction <add>, %29, %cst_11 [1] : vector<4x256xf32> to vector<4xf32>
    %c0_12 = arith.constant 0 : index
    %c0_13 = arith.constant 0 : index
    %c0_14 = arith.constant 0 : index
    %c0_15 = arith.constant 0 : index
    %31 = vector.load %arg5[%c0_12, %c0_13, %c0_14, %c0_15] : memref<1x1x3x4xf32, #tpu.memory_space<vmem>>, vector<1x1x3x4xf32>
    %32 = vector.shape_cast %31 : vector<1x1x3x4xf32> to vector<3x4xf32>
    %33 = vector.shape_cast %26 : vector<4xf32> to vector<1x4xf32>
    %34 = vector.shape_cast %27 : vector<4xf32> to vector<1x4xf32>
    %35 = vector.shape_cast %30 : vector<4xf32> to vector<1x4xf32>
    %36 = tpu.concatenate %33, %34, %35 in 0 : vector<1x4xf32>, vector<1x4xf32>, vector<1x4xf32> -> vector<3x4xf32>
    %37 = arith.addf %32, %36 : vector<3x4xf32>
    %c0_16 = arith.constant 0 : index
    %c0_17 = arith.constant 0 : index
    %c0_18 = arith.constant 0 : index
    %c0_19 = arith.constant 0 : index
    %38 = vector.load %arg5[%c0_16, %c0_17, %c0_18, %c0_19] : memref<1x1x3x4xf32, #tpu.memory_space<vmem>>, vector<1x1x3x4xf32>
    %39 = vector.shape_cast %38 : vector<1x1x3x4xf32> to vector<3x4xf32>
    %40 = vector.shape_cast %37 : vector<3x4xf32> to vector<1x1x3x4xf32>
    tpu.vector_store %arg5[%c0_16, %c0_17, %c0_18, %c0_19], %40 {strides = array<i32>} : memref<1x1x3x4xf32, #tpu.memory_space<vmem>>, vector<1x1x3x4xf32>,
    return
  }
  func.func @transform_0(%arg0: i32, %arg1: i32, %arg2: i32) -> (i32, i32, i32) {
    %c1_i32 = arith.constant 1 : i32
    %0 = arith.muli %arg0, %c1_i32 : i32
    %1 = arith.addi %0, %arg2 : i32
    %c0_i32 = arith.constant 0 : i32
    %2 = arith.minsi %1, %c0_i32 : i32
    %c0_i32_0 = arith.constant 0 : i32
    %c0_i32_1 = arith.constant 0 : i32
    return %arg1, %c0_i32_0, %2 : i32, i32, i32
  }
  func.func @transform_1(%arg0: i32, %arg1: i32, %arg2: i32) -> (i32, i32, i32) {
    %c1_i32 = arith.constant 1 : i32
    %0 = arith.muli %arg0, %c1_i32 : i32
    %1 = arith.addi %0, %arg2 : i32
    %c0_i32 = arith.constant 0 : i32
    %2 = arith.minsi %1, %c0_i32 : i32
    %c0_i32_0 = arith.constant 0 : i32
    %c0_i32_1 = arith.constant 0 : i32
    return %arg1, %c0_i32_0, %2 : i32, i32, i32
  }
  func.func @transform_2(%arg0: i32, %arg1: i32, %arg2: i32) -> (i32, i32, i32, i32) {
    %c0_i32 = arith.constant 0 : i32
    %c0_i32_0 = arith.constant 0 : i32
    %c0_i32_1 = arith.constant 0 : i32
    return %arg0, %arg1, %c0_i32, %c0_i32_0 : i32, i32, i32, i32
  }
}

</mosaic_0001>

<bundles_post_ra>
// kernel: tpu_custom_call.1
= control target key start
LH: loop header
LB: loop body
LE: loop exit
PB: predicated region body
PF: predicated region fallthrough
CT: control target
= control target key end

     0   :  { %7 = vsyncpa [#allocation3], 0  ;;  %s934_s0 = inlined_call_operand.hbm [shape: f32[2,4,256], index: 0, kind: input, shape index: {}]   ;;  %s935_s1 = inlined_call_operand.hbm [shape: s32[2,1,256], index: 1, kind: input, shape index: {}]   ;;  %s936_s2 = inlined_call_operand.vmem [shape: f32[1,2,3,4], index: 2, kind: output, shape index: {}]  }
   0x1   :  { %9 = vsyncpa [#allocation3 + $0x1], 0 }
   0x2   :  { %10 = vsyncpa [#allocation5], 0 }
   0x3   :  { %12 = vsyncpa [#allocation5 + $0x1], 0  ;;  %s731_s9 = smov 0   ;;  %s733_s10 = smov 0  }
   0x4   :  { %s735_s11 = smov 0   ;;  %s737_s12 = smov 0  }
   0x5   :  { %s739_s13 = smov 0   ;;  %s741_s14 = smov 0  }
   0x6 LB: > { %s509_s15 = sadd.s32 4294967295, %s711_s14   ;;  %s33_s16 = sadd.s32 1, %s707_s13  ;;  %s711_s14 = sphi %s741_s14, %s18_s14   ;;  %s707_s13 = sphi %s739_s13, %s950_s13   ;;  %s703_s12 = sphi %s737_s12, %s949_s12   ;;  %s699_s11 = sphi %s735_s11, %s948_s11   ;;  %s695_s10 = sphi %s733_s10, %s947_s10   ;;  %s691_s9 = sphi %s731_s9, %s946_s9  }
   0x7   : > { %p35_p0 = scmp.ge.s32.totalorder %s33_s16, 2  ;;  %s52_s17 = sadd.s32 1, %s699_s11 }
   0x8   : > { %p59_p1 = scmp.ne.s32.totalorder %s699_s11, %s695_s10  ;;  %p60_p2 = scmp.eq.s32.totalorder %s711_s14, 0 }
   0x9   : > { %s952_s16 = smov (%p35_p0, %s33_s16), 0  ;;  %p65_p4 = scmp.ne.s32.totalorder %s695_s10, %s691_s9 }
   0xa   : > { %p767_p3 = por %p60_p2, %p59_p1  ;;  %s47_s19 = ssub.s32 %s707_s13, %s952_s16 }
   0xb   : > { %p66_p5 = scmp.eq.s32.totalorder %s509_s15, 0  ;;  %p50_p6 = scmp.eq.s32.totalorder %s47_s19, 0 }
   0xc   : > { %p540_p8 = scmp.lt.s32.totalorder %s711_s14, 2  ;;  %s783_s22 = sand.u32 1, %s699_s11  }
   0xd   : > { %p774_p7 = por %p66_p5, %p65_p4  ;;  %s527_s23 = sshll.u32 %s707_s13, 7 }
   0xe   : > { %s780_s21 = scalar_select %p50_p6, %s699_s11, %s52_s17  }
   0xf   : > { %s939_s20 = scalar_select %p774_p7, 1, 0 }
  0x10   : > { %s513_s24 = sshll.u32 %s783_s22, 3  ;;  %s790_s27 = scalar_lea.hbm %s934_s0, %s527_s23 }
  0x11   : > { %s155_s28 = scalar_lea.vmem [#allocation2], %s513_s24  ;;  %p794_p9 = pnand %p540_p8, %p767_p3 }
  0x12   : > { %s168_s29 = sshll.u32 %s155_s28, 4  ;;  %s152_s3 = scalar_lea.sflag [#allocation3], %s783_s22  ;;  %s798_s29 = int_to_ptr.vmem [resolvable:$true] %s168_s29 }
  0x13   : > { %s597_s4 = scalar_lea.hbm %s790_s27, 128  ;;  %p599_p13 = pneg %p794_p9 }
  0x14   : > { %p598_p12 = scmp.ne.s32.totalorder %s790_s27, %s597_s4  ;;  %s602_s7 = scalar_lea.hbm %s934_s0, 256 }
  0x15   : > { %p603_p2 = scmp.lt.u32.totalorder %s790_s27, %s934_s0  ;;  %p604_p3 = scmp.lt.u32.totalorder %s602_s7, %s597_s4 }
  0x16   : > { %p600_p0 = pnand %p599_p13, %p598_p12  ;;  %p606_p5 = scmp.lt.u32.totalorder %s597_s4, %s790_s27 }
  0x17   : > { %p605_p4 = por %p604_p3, %p603_p2 }
  0x18   : > { %p601_p1 = pneg %p600_p0 }
  0x19   : > { %p607_p6 = por %p606_p5, %p605_p4 }
  0x1b   : > { %p608_p8 = pnand %p607_p6, %p601_p1 }
  0x1d   : > { %611 = shalt.err (!%p608_p8)
}
  0x1e   : > { %s612_s15 = scalar_lea.vmem %s798_s29, 128  ;;  %s713_s17 = smov [#allocation2]  }
  0x1f   : > { %p613_p12 = scmp.ne.s32.totalorder %s798_s29, %s612_s15  ;;  %s617_s18 = sshll.u32 %s713_s17, 4  ;;  %s618_s18 = int_to_ptr.vmem [resolvable:$false] %s617_s18 }
  0x20   : > { %s619_s19 = scalar_lea.vmem %s618_s18, 256  ;;  %p620_p11 = scmp.lt.s32.totalorder %s798_s29, %s618_s18 }
  0x21   : > { %p615_p0 = pnand %p613_p12, %p599_p13  ;;  %p621_p2 = scmp.lt.s32.totalorder %s619_s19, %s612_s15 }
  0x23   : > { %p616_p10 = pneg %p615_p0  ;;  %p622_p3 = por %p621_p2, %p620_p11 }
  0x25   : > { %p623_p4 = pnand %p622_p3, %p616_p10 }
  0x27   : > { %626 = shalt.err (!%p623_p4)
}
  0x28   : > { %536 = dma.hbm_to_vmem [thread:$0]  (!%p794_p9), %s790_s27, 128, %s798_s29, %s152_s3  }
  0x29   : > { %p941_p1 = scmp.lt.s32.totalorder %s711_s14, 3  ;;  %p942_p5 = scmp.ge.s32.totalorder %s711_s14, 1 }
  0x2a   : > { %s516_s24 = sshll.u32 %s783_s22, 1  ;;  %s528_s25 = sshll.u32 %s707_s13, 5 }
  0x2b   : > { %p832_p6 = pnand %p942_p5, %p941_p1  ;;  %s841_s4 = scalar_lea.hbm %s935_s1, %s528_s25 }
  0x2c   : > { %s179_s5 = scalar_lea.vmem [#allocation4], %s516_s24  ;;  %s176_s27 = scalar_lea.sflag [#allocation5], %s783_s22 }
  0x2d   : > { %s943_s23 = scalar_select %p832_p6, 1, 0 }
  0x2e   : > { %s192_s6 = sshll.u32 %s179_s5, 4  ;;  %s627_s29 = scalar_lea.hbm %s841_s4, 32  ;;  %s193_s6 = int_to_ptr.vmem [resolvable:$true] %s192_s6 }
  0x2f   : > { %p628_p10 = scmp.ne.s32.totalorder %s841_s4, %s627_s29  ;;  %s632_s8 = scalar_lea.hbm %s935_s1, 64 }
  0x30   : > { %p633_p12 = scmp.lt.u32.totalorder %s841_s4, %s935_s1  ;;  %p634_p0 = scmp.lt.u32.totalorder %s632_s8, %s627_s29 }
  0x31   : > { %p630_p11 = pnand %p628_p10, %p599_p13  ;;  %p636_p3 = scmp.lt.u32.totalorder %s627_s29, %s841_s4 }
  0x32   : > { %p635_p2 = por %p634_p0, %p633_p12 }
  0x33   : > { %p631_p8 = pneg %p630_p11 }
  0x34   : > { %p637_p4 = por %p636_p3, %p635_p2 }
  0x36   : > { %p638_p1 = pnand %p637_p4, %p631_p8 }
  0x38   : > { %641 = shalt.err (!%p638_p1)
}
  0x39   : > { %s642_s22 = scalar_lea.vmem %s193_s6, 32  ;;  %s714_s17 = smov [#allocation4]  }
  0x3a   : > { %p643_p5 = scmp.ne.s32.totalorder %s193_s6, %s642_s22  ;;  %s647_s18 = sshll.u32 %s714_s17, 4  ;;  %s648_s18 = int_to_ptr.vmem [resolvable:$false] %s647_s18 }
  0x3b   : > { %s649_s19 = scalar_lea.vmem %s648_s18, 64  ;;  %p650_p7 = scmp.lt.s32.totalorder %s193_s6, %s648_s18 }
  0x3c   : > { %p645_p10 = pnand %p643_p5, %p599_p13  ;;  %p651_p6 = scmp.lt.s32.totalorder %s649_s19, %s642_s22 }
  0x3e   : > { %p646_p11 = pneg %p645_p10  ;;  %p652_p0 = por %p651_p6, %p650_p7 }
  0x40   : > { %p653_p12 = pnand %p652_p0, %p646_p11 }
  0x42   : > { %656 = shalt.err (!%p653_p12)
}
  0x43   : > { %539 = dma.hbm_to_vmem [thread:$0]  (!%p794_p9), %s841_s4, 32, %s193_s6, %s176_s27  }
  0x44   : > { %p944_p8 = scmp.ne.s32.totalorder %s943_s23, 0 }
  0x45   : > { %s203_s24 = sand.u32 (!%p944_p8), 1, %s695_s10   ;;  %p945_p13 = scmp.ne.s32.totalorder (!%p944_p8), %s939_s20, 0 }
  0x46   : > { %201 = sbr.rel (%p944_p8) target bundleno = 310 (0x136), region = 28  ;;  %s520_s25 = sshll.u32 (!%p944_p8), %s203_s24, 3 }
  0x47   : > { %s204_s26 = scalar_lea.sflag (!%p944_p8), [#allocation3], %s203_s24  ;;  %s207_s28 = scalar_lea.vmem (!%p944_p8), [#allocation2], %s520_s25 }
  0x4d   : > { %682 = dma.done.wait (%p945_p13), %s204_s26, 128  }
  0x4e   : > { %684 = vsyncadd (%p945_p13), %s204_s26, 4294967168  ;;  %s521_s5 = sshll.u32 %s203_s24, 1  ;;  %s213_s29 = scalar_lea.sflag [#allocation5], %s203_s24 }
  0x4f   : > { %s216_s30 = scalar_lea.vmem [#allocation4], %s521_s5 }
  0x50   : > { %686 = dma.done.wait (%p945_p13), %s213_s29, 32  }
  0x51   : > { %688 = vsyncadd (%p945_p13), %s213_s29, 4294967264  ;;  %v324_v0 = vlaneseq  ;;  %p255_p7 = scmp.lt.s32.totalorder %s703_s12, 1  ;;  %vm265_vm0 = vcmask 26624   ;;  %vm272_vm1 = vcmask 1043456   ;;  %v715_v6 = vmov 0.0   ;;  %v267_v7 = vld [vmem:[%s207_s28] sm:$0xff] }
  0x52   : > { %v268_v8 = vld [vmem:[%s216_s30] sm:$0x3]  ;;  %v270_v9 = vcombine.high %v267_v7, %v267_v7  ;;  %v273_v10 = vsel %vm272_vm1, %v267_v7, -inf  ;;  %vm381_vm4 = vcmask 1040384   ;;  %vm383_vm5 = vcmask 1041408  }
  0x53   : > { %v875_v1 = vshrl.u32 %v324_v0, 7  ;;  %s954_s12 = smov (!%p255_p7, %s703_s12), 1  ;;  %v363_v2 = vand.u32 127, %v324_v0  ;;  %v274_v13 = vrot.slane %v273_v10, 4 }
  0x54   : > { %s522_s23 = sshll.u32 %s954_s12, 2  ;;  %v280_v14 = vsel %vm272_vm1, %v270_v9, -inf }
  0x55   : > { %v328_v3 = vsub.s32 0, %v875_v1  ;;  %v332_v4 = vsub.s32 1, %v875_v1  ;;  %v881_v5 = vsub.s32 %v363_v2, %v875_v1  ;;  %s886_s6 = scalar_lea.vmem %s936_s2, %s522_s23  ;;  %v275_v15 = vmax.f32 %v273_v10, %v274_v13 }
  0x56   : > { %266 = vst.msk [vmem:[%s886_s6] sm:$0x7] %vm265_vm0, %v715_v6  ;;  %v281_v16 = vrot.slane %v280_v14, 4 }
  0x57   : > { %v329_v11 = vrot.slane %v268_v8, %v328_v3  ;;  %v333_v12 = vrot.slane %v268_v8, %v332_v4  ;;  %v276_v21 = vrot.slane %v275_v15, 2 }
  0x58   : > { %v282_v22 = vmax.f32 %v280_v14, %v281_v16 }
  0x59   : > { %vm334_vm2 = vcmp.eq.s32.totalorder %v875_v1, %v329_v11  ;;  %vm335_vm3 = vcmp.eq.s32.totalorder %v875_v1, %v333_v12  ;;  %v277_v24 = vmax.f32 %v275_v15, %v276_v21 }
  0x5a   : > { %v523_v17 = vsel %vm334_vm2, 1.0, %v715_v6  ;;  %v524_v18 = vsel %vm335_vm3, 1.0, %v715_v6  ;;  %v283_v25 = vrot.slane %v282_v22, 2 }
  0x5b   : > { %v355_v19 = vsel %vm272_vm1, %v523_v17, 0.0  ;;  %v356_v20 = vsel %vm272_vm1, %v524_v18, 0.0  ;;  %v278_v26 = vrot.slane %v277_v24, 1 }
  0x5c   : > { %v357_v23 = vadd.f32 %v356_v20, %v355_v19  ;;  %v284_v27 = vmax.f32 %v282_v22, %v283_v25 }
  0x5d   : > { %v279_v28 = vmax.f32 %v277_v24, %v278_v26  ;;  %v360_v12 = vld [vmem:[%s886_s6] sm:$0x7] }
  0x5e   : > { %358 = vadd.xlane.f32.xlu1 %v357_v23  ;;  %v285_v29 = vrot.slane %v284_v27, 1 }
  0x60   : > { %v286_v30 = vmax.f32 %v284_v27, %v285_v29 }
  0x62   : > { %v289_v31 = vcombine.low %v279_v28, %v286_v30 }
  0x64   : > { %v291_v32 = vsub.f32 %v267_v7, %v289_v31 }
  0x66   : > { %v292_v33 = vmul.f32 1.442695, %v291_v32 }
  0x68   : > { %591 = vpow2.f32 %v292_v33 }
  0x72   : > { %v592_v34 = vpop.eup %591 }
  0x73   : > { %v295_v35 = vcombine.high %v592_v34, %v592_v34  ;;  %v297_v36 = vsel %vm272_vm1, %v592_v34, 0.0 }
  0x74   : > { %v298_v37 = vrot.slane %v297_v36, 4 }
  0x75   : > { %v304_v38 = vsel %vm272_vm1, %v295_v35, 0.0 }
  0x76   : > { %v299_v39 = vadd.f32 %v298_v37, %v297_v36  ;;  %v305_v40 = vrot.slane %v304_v38, 4 }
  0x78   : > { %v300_v41 = vrot.slane %v299_v39, 2  ;;  %v306_v42 = vadd.f32 %v305_v40, %v304_v38 }
  0x7a   : > { %v301_v43 = vadd.f32 %v300_v41, %v299_v39  ;;  %v307_v44 = vrot.slane %v306_v42, 2 }
  0x7c   : > { %v302_v45 = vrot.slane %v301_v43, 1  ;;  %v308_v46 = vadd.f32 %v307_v44, %v306_v42 }
  0x7e   : > { %v303_v47 = vadd.f32 %v302_v45, %v301_v43  ;;  %v309_v48 = vrot.slane %v308_v46, 1 }
  0x80   : > { %v310_v49 = vadd.f32 %v309_v48, %v308_v46  ;;  %593 = vrcp.f32 %v303_v47 }
  0x82   : > { %595 = vrcp.f32 %v310_v49 }
  0x8a   : > { %v594_v50 = vpop.eup %593 }
  0x8b   : > { %v313_v51 = vmul.f32 %v594_v50, %v303_v47 }
  0x8c   : > { %v596_v52 = vpop.eup %595 }
  0x8d   : > { %v314_v53 = vmul.f32 %v596_v52, %v310_v49  ;;  %v315_v54 = vsub.f32 2.0, %v313_v51 }
  0x8f   : > { %v316_v55 = vsub.f32 2.0, %v314_v53  ;;  %v317_v56 = vmul.f32 %v594_v50, %v315_v54 }
  0x91   : > { %v318_v57 = vmul.f32 %v596_v52, %v316_v55 }
  0x93   : > { %v321_v58 = vcombine.low %v317_v56, %v318_v57 }
  0x95   : > { %v323_v59 = vmul.f32 %v592_v34, %v321_v58 }
  0x97   : > { %v337_v60 = vcombine.high %v323_v59, %v323_v59  ;;  %v339_v61 = vsel %vm334_vm2, %v323_v59, 0.0  ;;  %v346_v2 = vsel %vm272_vm1, %v323_v59, 0.0 }
  0x98   : > { %v341_v62 = vsel %vm272_vm1, %v339_v61, 0.0 }
  0x99   : > { %v340_v63 = vsel %vm335_vm3, %v337_v60, 0.0  ;;  %v347_v3 = vsel %vm272_vm1, %v337_v60, 0.0 }
  0x9a   : > { %v342_v0 = vsel %vm272_vm1, %v340_v63, 0.0  ;;  %v348_v6 = vadd.f32 %v347_v3, %v346_v2 }
  0x9b   : > { %v343_v4 = vadd.f32 %v342_v0, %v341_v62 }
  0x9d   : > { %344 = vadd.xlane.f32.xlu0 %v343_v4 }
  0xa1   : > { %349 = vadd.xlane.f32.xlu0 %v348_v6 }
  0xeb   : > { %v359_v8 = vpop.xlane.xlu1 %358 }
  0xec   : > { %v379_v10 = vrot.slane %v359_v8, %v881_v5 }
 0x12a   : > { %v345_v7 = vpop.xlane.xlu0 %344 }
 0x12b   : > { %v367_v1 = vrot.slane %v345_v7, %v881_v5 }
 0x12e   : > { %v350_v9 = vpop.xlane.xlu0 %349 }
 0x12f   : > { %v373_v11 = vrot.slane %v350_v9, %v881_v5 }
 0x131   : > { %v382_v13 = vsel %vm381_vm4, %v367_v1, %v373_v11 }
 0x132   : > { %v384_v14 = vsel %vm383_vm5, %v382_v13, %v379_v10 }
 0x133   : > { %v385_v15 = vadd.f32 %v384_v14, %v360_v12 }
 0x135   : > { %387 = vst.msk [vmem:[%s886_s6] sm:$0x7] %vm265_vm0, %v385_v15 }
 0x136 PF: > { %s18_s14 = sadd.s32 1, %s711_s14   ;;  %s946_s9 = smov %s695_s10 }
 0x137   : > { %p15_p9 = scmp.ge.s32.totalorder %s18_s14, 4   ;;  %s947_s10 = smov %s699_s11 }
 0x138   : > { %s948_s11 = smov %s780_s21  ;;  %s949_s12 = smov %s707_s13 }
 0x139   : > { %s950_s13 = smov %s952_s16  ;;  %17 = sbr.rel (!%p15_p9) target bundleno = 6 (0x6), region = 85 }
 0x140   :  { %415 = vsyncpa [#allocation3], 1 }
 0x141   :  { %417 = vsyncpa [#allocation3 + $0x1], 1 }
 0x142   :  { %418 = vsyncpa [#allocation5], 1 }
 0x143   :  { %420 = vsyncpa [#allocation5 + $0x1], 1 }

</bundles_post_ra>
